<compile_context>
chip_gen: v7x
topology: tpu7x:2x2x1
jax: 0.10.0
libtpu: 0.0.40
codegen_flags: <defaults>
</compile_context>

<pallas_src>
import math
import numpy as np
import jax
import jax.numpy as jnp
from jax.experimental import pallas as pl
from jax.experimental.pallas import tpu as pltpu


# ----------------------------------------------------------------------------
# Base ("cell") anchor construction — pure numpy, runs once at module init,
# mirrors the reference _generate_anchors / generate_anchors code exactly.
# ----------------------------------------------------------------------------
def _mkanchors(ws, hs, x_ctr, y_ctr):
    ws = ws[:, np.newaxis]
    hs = hs[:, np.newaxis]
    return np.hstack((x_ctr - 0.5 * (ws - 1), y_ctr - 0.5 * (hs - 1),
                      x_ctr + 0.5 * (ws - 1), y_ctr + 0.5 * (hs - 1)))


def _whctrs(anchor):
    w = anchor[2] - anchor[0] + 1
    h = anchor[3] - anchor[1] + 1
    x_ctr = anchor[0] + 0.5 * (w - 1)
    y_ctr = anchor[1] + 0.5 * (h - 1)
    return w, h, x_ctr, y_ctr


def _ratio_enum(anchor, ratios):
    w, h, x_ctr, y_ctr = _whctrs(anchor)
    size = w * h
    size_ratios = size / ratios
    ws = np.round(np.sqrt(size_ratios))
    hs = np.round(ws * ratios)
    return _mkanchors(ws, hs, x_ctr, y_ctr)


def _scale_enum(anchor, scales):
    w, h, x_ctr, y_ctr = _whctrs(anchor)
    ws = w * scales
    hs = h * scales
    return _mkanchors(ws, hs, x_ctr, y_ctr)


def _generate_anchors(base_size, scales, aspect_ratios):
    anchor = np.array([1, 1, base_size, base_size], dtype=np.float64) - 1
    anchors = _ratio_enum(anchor, aspect_ratios)
    anchors = np.vstack([_scale_enum(anchors[i, :], scales)
                         for i in range(anchors.shape[0])])
    return anchors


def generate_anchors(stride=16, sizes=(32, 64, 128, 256, 512),
                     aspect_ratios=(0.5, 1, 2)):
    return _generate_anchors(stride,
                             np.array(sizes, dtype=np.float64) / stride,
                             np.array(aspect_ratios, dtype=np.float64))


# ----------------------------------------------------------------------------
# Tiling helpers (all Python-static).
# ----------------------------------------------------------------------------
_LANES = 128
_MAX_ROWS_F32 = 2016   # ~1 MiB per (rows,128) f32 buffer
_MAX_ROWS_I8 = 1152


def _lcm(a, b):
    return a * b // math.gcd(a, b)


def _round_up(x, m):
    return ((x + m - 1) // m) * m


def _anchor_tiling(hw, a4):
    """Tile rows for the flat (HW*A*4,) -> (rows,128) f32 anchor slab."""
    rows = -(-(hw * a4) // _LANES)
    period = a4 // math.gcd(a4, _LANES)        # rows after which (f % A4) repeats
    unit = _lcm(8, period)                     # f32 sublane + pattern alignment
    cap = (_MAX_ROWS_F32 // unit) * unit or unit
    if rows <= cap:
        tm = _round_up(rows, 8)
        return tm, tm, 1
    rows_pad = _round_up(rows, cap)
    return cap, rows_pad, rows_pad // cap


def _vis_tiling(hw, a):
    """Tile rows for the flat (HW*A,) -> (rows,128) int8 visibility slab."""
    rows = -(-(hw * a) // _LANES)
    period = a // math.gcd(a, _LANES)
    unit = _lcm(32, period)                    # int8 sublane tile is (32,128)
    cap = (_MAX_ROWS_I8 // unit) * unit or unit
    if rows <= cap:
        tmv = _round_up(rows, 32)
        return tmv, tmv, 1
    rows_pad = _round_up(rows, cap)
    return cap, rows_pad, rows_pad // cap


def _anchor_patterns(base_flat_f32, a4, tm):
    """Constant per-tile patterns for the anchor kernel (valid for every tile
    because tm is a multiple of the flat-index period)."""
    f = np.arange(tm * _LANES, dtype=np.int64)
    base_pat = base_flat_f32[f % a4].reshape(tm, _LANES).astype(np.float32)
    hw_pat = (f // a4).astype(np.float32).reshape(tm, _LANES)
    return jnp.asarray(base_pat), jnp.asarray(hw_pat)


def _vis_patterns(base_f32, a, tmv):
    """Stacked (5, tmv, 128) f32 patterns: [hw_offset, x1, y1, x2, y2] base values."""
    av = np.arange(tmv * _LANES, dtype=np.int64)
    ai = av % a
    pats = np.stack([(av // a).astype(np.float32),
                     base_f32[ai, 0], base_f32[ai, 1],
                     base_f32[ai, 2], base_f32[ai, 3]], axis=0)
    return jnp.asarray(pats.reshape(5, tmv, _LANES).astype(np.float32))


# ----------------------------------------------------------------------------
# Kernel 1: anchors for one feature level (image independent).
#   output flat layout: f = (hw*A + a)*4 + c   ->   (rows, 128) f32, lane dense
# ----------------------------------------------------------------------------
def _anchors_level(base_anchors_f32, gh, gw, stride):
    A = base_anchors_f32.shape[0]
    A4 = 4 * A
    HW = gh * gw
    TM, rows_pad, n_tiles = _anchor_tiling(HW, A4)
    base_pat, hw_pat = _anchor_patterns(base_anchors_f32.reshape(-1), A4, TM)

    hw_per_tile = (TM * _LANES) // A4          # exact: TM % period == 0 (or 1 tile)
    inv_gw = 1.0 / float(gw)
    gw_f = float(gw)
    stride_f = float(stride)

    def kernel(base_ref, hw_ref, out_ref):
        # global grid-location index hw = flat_index // (4*A)
        hw0 = (pl.program_id(0) * hw_per_tile).astype(jnp.float32)
        hw = hw0 + hw_ref[...]
        # exact float floor-division (exact while (gh+1)*gw < ~4e6)
        y = jnp.floor((hw + 0.5) * inv_gw)
        x = hw - y * gw_f
        lane = jax.lax.broadcasted_iota(jnp.int32, (TM, _LANES), 1)
        # coord index c = f % 4; even c -> shift_x, odd c -> shift_y
        shift = jnp.where((lane & 1) == 0, x, y) * stride_f
        out_ref[...] = shift + base_ref[...]

    slab = pl.pallas_call(
        kernel,
        out_shape=jax.ShapeDtypeStruct((rows_pad, _LANES), jnp.float32),
        grid=(n_tiles,),
        in_specs=[pl.BlockSpec((TM, _LANES), lambda i: (0, 0)),   # base pattern (resident)
                  pl.BlockSpec((TM, _LANES), lambda i: (0, 0))],  # hw pattern (resident)
        out_specs=pl.BlockSpec((TM, _LANES), lambda i: (i, 0)),
        compiler_params=pltpu.CompilerParams(
            dimension_semantics=("parallel",)),
    )(base_pat, hw_pat)

    # Row-major flat order already matches (HW*A, 4); trim padding (free when
    # HW*A4 is a multiple of 128, i.e. HW % 32 == 0).
    return slab.reshape(-1)[:HW * A4].reshape(HW * A, 4)


# ----------------------------------------------------------------------------
# Kernel 2: per-anchor visibility for ALL images of one feature level.
#   output layout: anchor index av = hw*A + a  ->  (n_images, rows, 128) int8
# ----------------------------------------------------------------------------
def _visibility_level(base_anchors_f32, gh, gw, stride, image_sizes, straddle_thresh):
    A = base_anchors_f32.shape[0]
    HW = gh * gw
    n_img = len(image_sizes)
    if straddle_thresh < 0:
        # Reference returns all-ones (torch.uint8); we return bool for a
        # consistent visibility dtype across both branches.
        return jnp.ones((n_img, HW * A), dtype=jnp.bool_)

    TMV, rows_pad, n_vt = _vis_tiling(HW, A)
    pats = _vis_patterns(base_anchors_f32, A, TMV)
    imsz = jnp.asarray(np.asarray(image_sizes, dtype=np.int32))  # (n_img, 2) = (h, w)

    hw_per_tile = (TMV * _LANES) // A
    inv_gw = 1.0 / float(gw)
    gw_f = float(gw)
    stride_f = float(stride)
    thr_f = float(straddle_thresh)

    def kernel(imsz_ref, pat_ref, vis_ref):
        im = pl.program_id(0)
        t = pl.program_id(1)
        ih = imsz_ref[im, 0].astype(jnp.float32)
        iw = imsz_ref[im, 1].astype(jnp.float32)

        hw = (t * hw_per_tile).astype(jnp.float32) + pat_ref[0]
        y = jnp.floor((hw + 0.5) * inv_gw)
        x = hw - y * gw_f
        sx = x * stride_f
        sy = y * stride_f
        ok = ((sx + pat_ref[1] >= -thr_f) &
              (sy + pat_ref[2] >= -thr_f) &
              (sx + pat_ref[3] < iw + thr_f) &
              (sy + pat_ref[4] < ih + thr_f))
        vis_ref[...] = jnp.where(ok, 1, 0).astype(vis_ref.dtype)

    slab = pl.pallas_call(
        kernel,
        out_shape=jax.ShapeDtypeStruct((n_img, rows_pad, _LANES), jnp.int8),
        grid=(n_img, n_vt),
        in_specs=[pl.BlockSpec(memory_space=pltpu.SMEM),                      # image sizes
                  pl.BlockSpec((5, TMV, _LANES), lambda im, t: (0, 0, 0))],   # patterns
        out_specs=pl.BlockSpec((None, TMV, _LANES), lambda im, t: (im, t, 0)),
        compiler_params=pltpu.CompilerParams(
            dimension_semantics=("parallel", "parallel")),
    )(imsz, pats)

    return slab.reshape(n_img, -1)[:, :HW * A] != 0   # (n_img, HW*A) bool


# ----------------------------------------------------------------------------
# AnchorGenerator (single-stride configuration, matching the reference where
# cell_anchors is only defined for len(anchor_strides) == 1).
# ----------------------------------------------------------------------------
class AnchorGeneratorPallas:
    def __init__(self, sizes=(32, 64, 128), aspect_ratios=(0.5, 1.0, 2.0),
                 anchor_strides=(16,), straddle_thresh=0):
        assert len(anchor_strides) == 1, \
            "reference only defines cell_anchors for a single stride"
        anchor_stride = anchor_strides[0]
        cell = generate_anchors(anchor_stride, sizes, aspect_ratios).astype(np.float32)
        self.strides = anchor_strides
        self.cell_anchors = [cell]            # BufferList equivalent (constant buffers)
        self.straddle_thresh = straddle_thresh

    def num_anchors_per_location(self):
        return [len(c) for c in self.cell_anchors]

    def forward(self, image_sizes, feature_maps):
        """image_sizes: list of (image_height, image_width); feature_maps: NCHW arrays."""
        grid_sizes = [fm.shape[-2:] for fm in feature_maps]

        # Anchors depend only on the feature grid; visibility additionally on
        # image size.  Compute each exactly once per level (all images share
        # the anchor slab; all image visibilities come from one kernel call).
        per_level = []
        for (gh, gw), stride, base in zip(grid_sizes, self.strides, self.cell_anchors):
            bbox = _anchors_level(base, int(gh), int(gw), stride)
            vis_all = _visibility_level(base, int(gh), int(gw), stride,
                                        image_sizes, self.straddle_thresh)
            per_level.append((bbox, vis_all))

        anchors = []
        for idx, (image_height, image_width) in enumerate(image_sizes):
            anchors_in_image = []
            for bbox, vis_all in per_level:
                # BoxList equivalent: bbox + size + mode + 'visibility' field
                anchors_in_image.append({
                    "bbox": bbox,
                    "size": (image_width, image_height),
                    "mode": "xyxy",
                    "visibility": vis_all[idx],
                })
            anchors.append(anchors_in_image)
        return anchors


# ----------------------------------------------------------------------------
# Pure-numpy reference of grid_anchors + add_visibility_to (for verification)
# ----------------------------------------------------------------------------
def _reference(base, gh, gw, stride, img_h, img_w, thresh):
    shift_x = np.arange(0, gw * stride, stride, dtype=np.float32)
    shift_y = np.arange(0, gh * stride, stride, dtype=np.float32)
    sy, sx = np.meshgrid(shift_y, shift_x, indexing="ij")
    sx = sx.reshape(-1)
    sy = sy.reshape(-1)
    shifts = np.stack((sx, sy, sx, sy), axis=1)
    anchors = (shifts.reshape(-1, 1, 4) + base.reshape(1, -1, 4)).reshape(-1, 4)
    vis = ((anchors[:, 0] >= -thresh) & (anchors[:, 1] >= -thresh) &
           (anchors[:, 2] < img_w + thresh) & (anchors[:, 3] < img_h + thresh))
    return anchors.astype(np.float32), vis


if __name__ == "__main__":
    key = jax.random.PRNGKey(0)
    # Small shapes: batch=2, channels=4, spatial=16x16, stride=16
    feature_map = jax.random.normal(key, (2, 4, 16, 16), dtype=jnp.float32)
    image_sizes = [(256, 256), (224, 240)]   # (image_height, image_width) per image

    gen = AnchorGeneratorPallas(sizes=(32, 64, 128), aspect_ratios=(0.5, 1.0, 2.0),
                                anchor_strides=(16,), straddle_thresh=0)
    out = gen.forward(image_sizes, [feature_map])
    jax.block_until_ready(jax.tree_util.tree_leaves(
        [[(b["bbox"], b["visibility"]) for b in per_img] for per_img in out]))

    # Verify against pure-numpy reference of the torch semantics (exact match).
    gh, gw = feature_map.shape[-2:]
    for (ih, iw), per_img in zip(image_sizes, out):
        ref_a, ref_v = _reference(gen.cell_anchors[0], gh, gw, gen.strides[0],
                                  ih, iw, gen.straddle_thresh)
        np.testing.assert_allclose(np.asarray(per_img[0]["bbox"]), ref_a, rtol=0, atol=0)
        np.testing.assert_array_equal(np.asarray(per_img[0]["visibility"]), ref_v)

    print("KERNEL_OK")
</pallas_src>

<mosaic_0001>
module attributes {stable_mosaic.version = 11 : i64} {
  func.func @kernel(%arg0: i32, %arg1: memref<72x128xf32, #tpu.memory_space<vmem>>, %arg2: memref<72x128xf32, #tpu.memory_space<vmem>>, %arg3: memref<72x128xf32, #tpu.memory_space<vmem>>) attributes {dimension_semantics = [#tpu.dimension_semantics<parallel>], iteration_bounds = array<i64: 1>, scalar_prefetch = 0 : i64, scratch_operands = 0 : i64, tpu.core_type = #tpu.core_type<tc>, window_params = [{pipeline_mode = #tpu.pipeline_mode<synchronous>, transform_indices = @transform_0, window_bounds = array<i64: 72, 128>}, {pipeline_mode = #tpu.pipeline_mode<synchronous>, transform_indices = @transform_1, window_bounds = array<i64: 72, 128>}, {transform_indices = @transform_2, window_bounds = array<i64: 72, 128>}]} {
    %c256_i32 = arith.constant 256 : i32
    %0 = arith.muli %arg0, %c256_i32 : i32
    %1 = arith.sitofp %0 : i32 to f32
    %c0 = arith.constant 0 : index
    %c0_0 = arith.constant 0 : index
    %2 = vector.load %arg2[%c0, %c0_0] : memref<72x128xf32, #tpu.memory_space<vmem>>, vector<72x128xf32>
    %3 = vector.broadcast %1 : f32 to vector<72x128xf32>
    %4 = arith.addf %3, %2 : vector<72x128xf32>
    %cst = arith.constant 5.000000e-01 : f32
    %5 = vector.broadcast %cst : f32 to vector<72x128xf32>
    %6 = arith.addf %4, %5 : vector<72x128xf32>
    %cst_1 = arith.constant 6.250000e-02 : f32
    %7 = vector.broadcast %cst_1 : f32 to vector<72x128xf32>
    %8 = arith.mulf %6, %7 : vector<72x128xf32>
    %9 = math.floor %8 : vector<72x128xf32>
    %cst_2 = arith.constant 1.600000e+01 : f32
    %10 = vector.broadcast %cst_2 : f32 to vector<72x128xf32>
    %11 = arith.mulf %9, %10 : vector<72x128xf32>
    %12 = arith.subf %4, %11 : vector<72x128xf32>
    %13 = tpu.iota {dimensions = array<i32: 1>} : vector<72x128xi32>
    %c1_i32 = arith.constant 1 : i32
    %14 = vector.broadcast %c1_i32 : i32 to vector<72x128xi32>
    %15 = arith.andi %13, %14 : vector<72x128xi32>
    %c0_i32 = arith.constant 0 : i32
    %16 = vector.broadcast %c0_i32 : i32 to vector<72x128xi32>
    %17 = arith.cmpi eq, %15, %16 : vector<72x128xi32>
    %18 = arith.select %17, %12, %9 : vector<72x128xi1>, vector<72x128xf32>
    %cst_3 = arith.constant 1.600000e+01 : f32
    %19 = vector.broadcast %cst_3 : f32 to vector<72x128xf32>
    %20 = arith.mulf %18, %19 : vector<72x128xf32>
    %c0_4 = arith.constant 0 : index
    %c0_5 = arith.constant 0 : index
    %21 = vector.load %arg1[%c0_4, %c0_5] : memref<72x128xf32, #tpu.memory_space<vmem>>, vector<72x128xf32>
    %22 = arith.addf %20, %21 : vector<72x128xf32>
    %c0_6 = arith.constant 0 : index
    %c0_7 = arith.constant 0 : index
    %23 = vector.load %arg3[%c0_6, %c0_7] : memref<72x128xf32, #tpu.memory_space<vmem>>, vector<72x128xf32>
    tpu.vector_store %arg3[%c0_6, %c0_7], %22 {strides = array<i32>} : memref<72x128xf32, #tpu.memory_space<vmem>>, vector<72x128xf32>,
    return
  }
  func.func @transform_0(%arg0: i32) -> (i32, i32) {
    %c0_i32 = arith.constant 0 : i32
    %c0_i32_0 = arith.constant 0 : i32
    %c0_i32_1 = arith.constant 0 : i32
    return %c0_i32, %c0_i32_0 : i32, i32
  }
  func.func @transform_1(%arg0: i32) -> (i32, i32) {
    %c0_i32 = arith.constant 0 : i32
    %c0_i32_0 = arith.constant 0 : i32
    %c0_i32_1 = arith.constant 0 : i32
    return %c0_i32, %c0_i32_0 : i32, i32
  }
  func.func @transform_2(%arg0: i32) -> (i32, i32) {
    %c0_i32 = arith.constant 0 : i32
    %c0_i32_0 = arith.constant 0 : i32
    return %arg0, %c0_i32 : i32, i32
  }
}

</mosaic_0001>

<bundles_post_ra>
// kernel: tpu_custom_call.1
= control target key start
LH: loop header
LB: loop body
LE: loop exit
PB: predicated region body
PF: predicated region fallthrough
CT: control target
= control target key end

     0   :  { %7 = vsyncpa [#allocation3], 0  ;;  %s341_s0 = inlined_call_operand.hbm [shape: f32[72,128], index: 0, kind: input, shape index: {}]   ;;  %s342_s1 = inlined_call_operand.hbm [shape: f32[72,128], index: 1, kind: input, shape index: {}]   ;;  %s343_s2 = inlined_call_operand.hbm [shape: f32[72,128], index: 2, kind: output, shape index: {}]  }
   0x1   :  { %8 = vsyncpa [#allocation6], 0 }
   0x2   :  { %9 = vsyncpa [#allocation4], 0  ;;  %s250_s9 = smov [#allocation2]   ;;  %s178_s13 = scalar_lea.hbm %s341_s0, 1152 }
   0x3   :  { %s15_s10 = sshll.u32 %s250_s9, 4  ;;  %p179_p0 = scmp.ne.s32.totalorder %s341_s0, %s178_s13  ;;  %s16_s10 = int_to_ptr.vmem [resolvable:$true] %s15_s10 }
   0x4   :  { %p182_p1 = scmp.lt.u32.totalorder %s178_s13, %s341_s0 }
   0x6   :  { %p184_p2 = pnand %p182_p1, %p179_p0 }
   0x8   :  { %187 = shalt.err (!%p184_p2)
}
   0x9   :  { %s188_s18 = scalar_lea.vmem %s16_s10, 1152  ;;  %p193_p4 = scmp.lt.s32.totalorder %s16_s10, %s16_s10 }
   0xa   :  { %p189_p3 = scmp.ne.s32.totalorder %s16_s10, %s188_s18  ;;  %p194_p5 = scmp.lt.s32.totalorder %s188_s18, %s188_s18 }
   0xc   :  { %p195_p6 = por %p194_p5, %p193_p4 }
   0xe   :  { %p196_p7 = pnand %p195_p6, %p189_p3 }
  0x10   :  { %199 = shalt.err (!%p196_p7)
}
  0x11   :  { %s251_s19 = smov 128   ;;  %s252_s20 = smov 8  }
  0x12   :  { %21 = dma.hbm_to_vmem [thread:$0]  %s341_s0, 1152, %s16_s10, [#allocation3], %s251_s19, %s251_s19, %s252_s20  }
  0x13   :  { %s253_s23 = smov [#allocation5]   ;;  %s200_s27 = scalar_lea.hbm %s342_s1, 1152 }
  0x14   :  { %s27_s24 = sshll.u32 %s253_s23, 4  ;;  %p201_p8 = scmp.ne.s32.totalorder %s342_s1, %s200_s27  ;;  %s28_s24 = int_to_ptr.vmem [resolvable:$true] %s27_s24 }
  0x15   :  { %p204_p9 = scmp.lt.u32.totalorder %s200_s27, %s342_s1 }
  0x17   :  { %p206_p10 = pnand %p204_p9, %p201_p8 }
  0x19   :  { %209 = shalt.err (!%p206_p10)
}
  0x1a   :  { %s210_s4 = scalar_lea.vmem %s28_s24, 1152  ;;  %p215_p12 = scmp.lt.s32.totalorder %s28_s24, %s28_s24 }
  0x1b   :  { %p211_p11 = scmp.ne.s32.totalorder %s28_s24, %s210_s4  ;;  %p216_p13 = scmp.lt.s32.totalorder %s210_s4, %s210_s4 }
  0x1d   :  { %p217_p0 = por %p216_p13, %p215_p12 }
  0x1f   :  { %p218_p1 = pnand %p217_p0, %p211_p11 }
  0x21   :  { %221 = shalt.err (!%p218_p1)
}
  0x22   :  { %33 = dma.hbm_to_vmem [thread:$0]  %s342_s1, 1152, %s28_s24, [#allocation6], %s251_s19, %s251_s19, %s252_s20  }
  0x23   :  { %244 = dma.done.wait [#allocation3], 1152  }
  0x24   :  { %245 = vsyncadd [#allocation3], 4294966144 }
  0x25   :  { %246 = dma.done.wait [#allocation6], 1152  }
  0x26   :  { %247 = vsyncadd [#allocation6], 4294966144  ;;  %v106_v0 = vlaneseq  ;;  %v42_v2 = vld [vmem:[#allocation5] sm:$0xff]  ;;  %v43_v4 = vld [vmem:[#allocation5 + $0x8] sm:$0xff]  ;;  %s254_s1 = smov [#allocation7]  }
  0x27   :  { %v61_v5 = vadd.f32 0.5, %v42_v2  ;;  %v62_v6 = vadd.f32 0.5, %v43_v4  ;;  %v44_v7 = vld [vmem:[#allocation5 + $0x10] sm:$0xff]  ;;  %v45_v9 = vld [vmem:[#allocation5 + $0x18] sm:$0xff]  ;;  %v46_v10 = vld [vmem:[#allocation5 + $0x20] sm:$0xff]  ;;  %s160_s6 = sshll.u32 %s254_s1, 4  ;;  %s161_s6 = int_to_ptr.vmem [resolvable:$true] %s160_s6 }
  0x28   :  { %v107_v1 = vand.u32 127, %v106_v0  ;;  %v63_v8 = vadd.f32 0.5, %v44_v7  ;;  %v64_v13 = vadd.f32 0.5, %v45_v9  ;;  %v65_v14 = vadd.f32 0.5, %v46_v10  ;;  %v47_v15 = vld [vmem:[#allocation5 + $0x28] sm:$0xff]  ;;  %v48_v19 = vld [vmem:[#allocation5 + $0x30] sm:$0xff]  ;;  %p227_p3 = scmp.lt.s32.totalorder %s161_s6, %s161_s6 }
  0x29   :  { %v70_v11 = vmul.f32 0.0625, %v61_v5  ;;  %v71_v12 = vmul.f32 0.0625, %v62_v6  ;;  %v66_v18 = vadd.f32 0.5, %v47_v15  ;;  %v304_v24 = vld [vmem:[#allocation5 + $0x38] sm:$0xff]  ;;  %v67_v27 = vadd.f32 0.5, %v48_v19  ;;  %v129_v48 = vld [vmem:[#allocation2 + $0x8] sm:$0xff] }
  0x2a   :  { %v108_v3 = vand.u32 1, %v107_v1  ;;  %v72_v17 = vmul.f32 0.0625, %v63_v8  ;;  %v73_v22 = vmul.f32 0.0625, %v64_v13  ;;  %v74_v23 = vmul.f32 0.0625, %v65_v14  ;;  %v128_v46 = vld [vmem:[#allocation2] sm:$0xff]  ;;  %v130_v54 = vld [vmem:[#allocation2 + $0x10] sm:$0xff] }
  0x2b   :  { %v79_v20 = vfloor.f32 %v70_v11  ;;  %v80_v21 = vfloor.f32 %v71_v12  ;;  %v75_v26 = vmul.f32 0.0625, %v66_v18  ;;  %v68_v28 = vadd.f32 0.5, %v304_v24  ;;  %v131_v58 = vld [vmem:[#allocation2 + $0x18] sm:$0xff]  ;;  %v132_v60 = vld [vmem:[#allocation2 + $0x20] sm:$0xff]  ;;  %v50_v62 = vld [vmem:[#allocation5 + $0x40] sm:$0xff]  ;;  %s222_s7 = scalar_lea.vmem %s161_s6, 1152 }
  0x2c   :  { %vm300_vm0 = vcmp.eq.s32.totalorder %v108_v3, 0  ;;  %v81_v25 = vfloor.f32 %v72_v17  ;;  %v82_v31 = vfloor.f32 %v73_v22  ;;  %v83_v32 = vfloor.f32 %v74_v23  ;;  %v133_v5 = vld [vmem:[#allocation2 + $0x28] sm:$0xff]  ;;  %v134_v13 = vld [vmem:[#allocation2 + $0x30] sm:$0xff]  ;;  %p223_p2 = scmp.ne.s32.totalorder %s161_s6, %s222_s7  ;;  %p228_p4 = scmp.lt.s32.totalorder %s222_s7, %s222_s7 }
  0x2d   :  { %v88_v29 = vmul.f32 16.0, %v79_v20  ;;  %v89_v30 = vmul.f32 16.0, %v80_v21  ;;  %v84_v34 = vfloor.f32 %v75_v26  ;;  %v76_v35 = vmul.f32 0.0625, %v67_v27 }
  0x2e   :  { %v90_v33 = vmul.f32 16.0, %v81_v25  ;;  %v77_v36 = vmul.f32 0.0625, %v68_v28  ;;  %v91_v39 = vmul.f32 16.0, %v82_v31  ;;  %v92_v40 = vmul.f32 16.0, %v83_v32  ;;  %v136_v28 = vld [vmem:[#allocation2 + $0x40] sm:$0xff]  ;;  %p229_p5 = por %p228_p4, %p227_p3 }
  0x2f   :  { %v97_v37 = vsub.f32 %v42_v2, %v88_v29  ;;  %v98_v38 = vsub.f32 %v43_v4, %v89_v30  ;;  %v93_v42 = vmul.f32 16.0, %v84_v34  ;;  %v85_v43 = vfloor.f32 %v76_v35 }
  0x30   :  { %v99_v41 = vsub.f32 %v44_v7, %v90_v33  ;;  %v86_v44 = vfloor.f32 %v77_v36  ;;  %v100_v49 = vsub.f32 %v45_v9, %v91_v39  ;;  %v101_v50 = vsub.f32 %v46_v10, %v92_v40  ;;  %p230_p6 = pnand %p229_p5, %p223_p2 }
  0x31   :  { %v110_v45 = vsel %vm300_vm0, %v97_v37, %v79_v20  ;;  %v111_v47 = vsel %vm300_vm0, %v98_v38, %v80_v21  ;;  %v102_v55 = vsub.f32 %v47_v15, %v93_v42  ;;  %v94_v61 = vmul.f32 16.0, %v85_v43  ;;  %v135_v20 = vld [vmem:[#allocation2 + $0x38] sm:$0xff] }
  0x32   :  { %v119_v51 = vmul.f32 16.0, %v110_v45  ;;  %v120_v52 = vmul.f32 16.0, %v111_v47  ;;  %v112_v53 = vsel %vm300_vm0, %v99_v41, %v81_v25  ;;  %v113_v57 = vsel %vm300_vm0, %v100_v49, %v82_v31 }
  0x33   :  { %v121_v56 = vmul.f32 16.0, %v112_v53  ;;  %v114_v59 = vsel %vm300_vm0, %v101_v50, %v83_v32  ;;  %v122_v1 = vmul.f32 16.0, %v113_v57  ;;  %v115_v4 = vsel %vm300_vm0, %v102_v55, %v84_v34 }
  0x34   :  { %v137_v63 = vadd.f32 %v128_v46, %v119_v51  ;;  %v138_v0 = vadd.f32 %v129_v48, %v120_v52  ;;  %v123_v2 = vmul.f32 16.0, %v114_v59  ;;  %v103_v6 = vsub.f32 %v48_v19, %v94_v61 }
  0x35   :  { %v139_v3 = vadd.f32 %v130_v54, %v121_v56  ;;  %v95_v7 = vmul.f32 16.0, %v86_v44  ;;  %v140_v8 = vadd.f32 %v131_v58, %v122_v1  ;;  %v124_v10 = vmul.f32 16.0, %v115_v4 }
  0x36   :  { %146 = vst [vmem:[#allocation7] sm:$0xff] %v137_v63  ;;  %147 = vst [vmem:[#allocation7 + $0x8] sm:$0xff] %v138_v0  ;;  %v141_v9 = vadd.f32 %v132_v60, %v123_v2  ;;  %v69_v11 = vadd.f32 0.5, %v50_v62  ;;  %v116_v12 = vsel %vm300_vm0, %v103_v6, %v85_v43 }
  0x37   :  { %148 = vst [vmem:[#allocation7 + $0x10] sm:$0xff] %v139_v3  ;;  %v104_v14 = vsub.f32 %v304_v24, %v95_v7  ;;  %149 = vst [vmem:[#allocation7 + $0x18] sm:$0xff] %v140_v8  ;;  %v142_v15 = vadd.f32 %v133_v5, %v124_v10  ;;  %v125_v17 = vmul.f32 16.0, %v116_v12 }
  0x38   :  { %150 = vst [vmem:[#allocation7 + $0x20] sm:$0xff] %v141_v9  ;;  %v78_v18 = vmul.f32 0.0625, %v69_v11 }
  0x39   :  { %v117_v19 = vsel %vm300_vm0, %v104_v14, %v86_v44  ;;  %151 = vst [vmem:[#allocation7 + $0x28] sm:$0xff] %v142_v15  ;;  %v143_v21 = vadd.f32 %v134_v13, %v125_v17 }
  0x3a   :  { %v126_v22 = vmul.f32 16.0, %v117_v19  ;;  %v87_v23 = vfloor.f32 %v78_v18 }
  0x3b   :  { %152 = vst [vmem:[#allocation7 + $0x30] sm:$0xff] %v143_v21 }
  0x3c   :  { %v144_v25 = vadd.f32 %v135_v20, %v126_v22  ;;  %v96_v26 = vmul.f32 16.0, %v87_v23 }
  0x3e   :  { %153 = vst [vmem:[#allocation7 + $0x38] sm:$0xff] %v144_v25  ;;  %v105_v27 = vsub.f32 %v50_v62, %v96_v26 }
  0x40   :  { %v118_v24 = vsel %vm300_vm0, %v105_v27, %v87_v23 }
  0x41   :  { %v127_v29 = vmul.f32 16.0, %v118_v24 }
  0x43   :  { %v145_v30 = vadd.f32 %v136_v28, %v127_v29 }
  0x45   :  { %154 = vst [vmem:[#allocation7 + $0x40] sm:$0xff] %v145_v30 }
  0x46   :  { %233 = shalt.err (!%p230_p6)
}
  0x47   :  { %s234_s10 = scalar_lea.hbm %s343_s2, 1152 }
  0x48   :  { %p235_p7 = scmp.ne.s32.totalorder %s343_s2, %s234_s10  ;;  %p238_p8 = scmp.lt.u32.totalorder %s234_s10, %s343_s2 }
  0x4a   :  { %p240_p9 = pnand %p238_p8, %p235_p7 }
  0x4c   :  { %243 = shalt.err (!%p240_p9)
}
  0x4d   :  { %166 = dma.vmem_to_hbm [thread:$0]  %s161_s6, 1152, %s343_s2, [#allocation4], %s251_s19, %s251_s19, %s252_s20  }
  0x4e   :  { %248 = dma.done.wait [#allocation4], 1152  }
  0x4f   :  { %249 = vsyncadd [#allocation4], 4294966144 }
  0x50   :  { %170 = vsyncpa [#allocation3], 1 }
  0x51   :  { %171 = vsyncpa [#allocation6], 1 }
  0x52   :  { %172 = vsyncpa [#allocation4], 1 }

</bundles_post_ra>
